<compile_context>
chip_gen: v7x
topology: tpu7x:2x2x1
jax: 0.10.0
libtpu: 0.0.40
codegen_flags: <defaults>
</compile_context>

<pallas_src>
import functools

import jax
import jax.numpy as jnp
from jax.experimental import pallas as pl
from jax.experimental.pallas import tpu as pltpu

IN_FEATURES = 128
OUT_FEATURES = 1
_W_PAD_COLS = 128          # pad the 1-column weight to a full MXU-friendly width


def _round_up(x, m):
    return ((x + m - 1) // m) * m


def _decoder_kernel(seed_ref, x_ref, w_ref, b_ref, o_ref, *, dropout_rate):
    # ---- Linear(128 -> 1) on the MXU -------------------------------------
    # x: (TM, 128); w: (128, 128) with the real fc weight in column 0.
    # Full-precision f32 matmul (same precision pl.dot would request); only
    # column 0 of the product is consumed.
    x = x_ref[...].astype(jnp.float32)
    w = w_ref[...].astype(jnp.float32)
    z = jnp.dot(x, w, preferred_element_type=jnp.float32,
                precision=jax.lax.Precision.HIGHEST)          # (TM, 128)
    y = z[:, 0:1] + b_ref[0]                                  # (TM, 1) f32

    # ---- Dropout (inverted scaling, train mode only) ----------------------
    if dropout_rate > 0.0:
        tm = y.shape[0]
        # Counter-based RNG: murmur3-style finalizer over (global row, seed).
        # Depends only on the absolute row index -> deterministic and
        # independent of the tile size; generates exactly the (TM, 1) bits
        # that are consumed; no TPU PRNG state needed.
        row = jax.lax.broadcasted_iota(jnp.int32, (tm, 1), 0).astype(jnp.uint32)
        base = (pl.program_id(0) * tm).astype(jnp.uint32)
        seed = seed_ref[0].astype(jnp.uint32)
        h = (row + base) * jnp.uint32(0x9E3779B1) + seed
        h = h ^ (h >> 16)
        h = h * jnp.uint32(0x85EBCA6B)
        h = h ^ (h >> 13)
        h = h * jnp.uint32(0xC2B2AE35)
        h = h ^ (h >> 16)
        threshold = jnp.uint32(min(int(dropout_rate * 4294967296.0), 4294967295))
        keep = h >= threshold
        scale = jnp.float32(1.0 / (1.0 - dropout_rate))
        y = jnp.where(keep, y * scale, jnp.float32(0.0))

    # ---- Tanh (EUP) + store ------------------------------------------------
    o_ref[...] = jnp.tanh(y).astype(o_ref.dtype)


def decoder_forward(x, w, b, seed, *, dropout_rate=0.0, training=False,
                    tile_m=4096):
    """x: (N, 128) f32 or bf16, w: (1, 128) (PyTorch nn.Linear layout),
    b: (1,), seed: (1,) int32."""
    n, d = x.shape
    assert d == IN_FEATURES
    assert w.shape == (OUT_FEATURES, IN_FEATURES)
    assert b.shape == (OUT_FEATURES,)

    rate = float(dropout_rate) if training else 0.0
    assert 0.0 <= rate < 1.0, "dropout rate must be in [0, 1)"

    # Pad the (1,128) weight into a (128,128) column matrix so the in-kernel
    # contraction is a standard MXU matmul; only column 0 is non-zero.
    w_mat = jnp.zeros((IN_FEATURES, _W_PAD_COLS), dtype=w.dtype).at[:, 0].set(w[0])

    # Row-tile selection: sublane-aligned (8 rows f32 / 16 rows bf16), clamped
    # for small batches, and capped so large batches keep >= 2 grid steps
    # (lets the "parallel" grid axis split across v7x's two TensorCores).
    sub = 8 if x.dtype == jnp.float32 else 16
    tile_m = int(tile_m)
    if n >= 2048:
        tile_m = min(tile_m, _round_up(pl.cdiv(n, 2), sub))
    else:
        tile_m = min(tile_m, _round_up(n, sub))
    tile_m = max(sub, _round_up(tile_m, sub))

    grid = (pl.cdiv(n, tile_m),)          # no padding copy of x: ragged last block
    kernel = functools.partial(_decoder_kernel, dropout_rate=rate)

    grid_spec = pltpu.PrefetchScalarGridSpec(
        num_scalar_prefetch=1,            # seed lands in SMEM
        grid=grid,
        in_specs=[
            pl.BlockSpec((tile_m, IN_FEATURES), lambda i, seed_ref: (i, 0)),
            pl.BlockSpec((IN_FEATURES, _W_PAD_COLS), lambda i, seed_ref: (0, 0)),
            pl.BlockSpec(memory_space=pltpu.MemorySpace.SMEM),   # bias scalar
        ],
        out_specs=pl.BlockSpec((tile_m, OUT_FEATURES), lambda i, seed_ref: (i, 0)),
    )

    return pl.pallas_call(
        kernel,
        out_shape=jax.ShapeDtypeStruct((n, OUT_FEATURES), x.dtype),
        grid_spec=grid_spec,
        compiler_params=pltpu.CompilerParams(
            # Row tiles are fully independent -> shard across both TCs on v7x.
            dimension_semantics=("parallel",),
            # 2 MiB input blocks double-buffered + lane-padded narrow output
            # buffers + matmul intermediate: comfortably under 32 MiB on all
            # generations (raises v5e's 16 MiB scoped default).
            vmem_limit_bytes=32 * 1024 * 1024),
    )(seed, x, w_mat, b)


def init_decoder_params(key):
    """Deterministic init matching nn.Linear(128, 1): w (1,128), b (1,)."""
    kw, kb = jax.random.split(key)
    bound = 1.0 / (IN_FEATURES ** 0.5)
    w = jax.random.uniform(kw, (OUT_FEATURES, IN_FEATURES), jnp.float32,
                           -bound, bound)
    b = jax.random.uniform(kb, (OUT_FEATURES,), jnp.float32, -bound, bound)
    return w, b


if __name__ == "__main__":
    key = jax.random.PRNGKey(0)
    k_param, k_x1, k_x2 = jax.random.split(key, 3)

    w, b = init_decoder_params(k_param)
    seed = jnp.array([1234], dtype=jnp.int32)
    dropout_rate = 0.1                           # opt.dropout_rate

    def linear_ref(x):
        # Exact-f32 reference for the linear layer (elementwise mul + reduce,
        # no MXU), so the only mismatch vs the kernel is MXU accumulation
        # rounding (~1e-6).
        return jnp.sum(x * w[0][None, :], axis=-1, keepdims=True) + b[0]

    # Case 1: tiny batch, single tile (eval mode -> match pure-JAX reference).
    x1 = jax.random.normal(k_x1, (16, IN_FEATURES), jnp.float32)
    out_eval1 = jax.block_until_ready(
        decoder_forward(x1, w, b, seed, dropout_rate=dropout_rate,
                        training=False))
    ref1 = jnp.tanh(linear_ref(x1))
    assert out_eval1.shape == (16, OUT_FEATURES)
    assert jnp.allclose(out_eval1, ref1, atol=1e-4, rtol=1e-4)

    # Case 2: batch (300) not a multiple of the tile -> ragged last block
    # handled by Pallas clamping (no padding copy of x in HBM).
    x2 = jax.random.normal(k_x2, (300, IN_FEATURES), jnp.float32)
    out_eval2 = jax.block_until_ready(
        decoder_forward(x2, w, b, seed, dropout_rate=dropout_rate,
                        training=False, tile_m=128))
    ref2 = jnp.tanh(linear_ref(x2))
    assert out_eval2.shape == (300, OUT_FEATURES)
    assert jnp.allclose(out_eval2, ref2, atol=1e-4, rtol=1e-4)

    # Training mode: inverted-dropout scaling (like nn.Dropout in train()),
    # deterministic given the seed.
    out_train_a = jax.block_until_ready(
        decoder_forward(x2, w, b, seed, dropout_rate=dropout_rate,
                        training=True, tile_m=128))
    out_train_b = jax.block_until_ready(
        decoder_forward(x2, w, b, seed, dropout_rate=dropout_rate,
                        training=True, tile_m=128))
    assert out_train_a.shape == (300, OUT_FEATURES)
    assert bool(jnp.all(jnp.isfinite(out_train_a)))
    assert bool(jnp.array_equal(out_train_a, out_train_b))
    # Each output is either tanh(0)=0 (dropped) or tanh(linear / (1-p)) (kept).
    scaled = jnp.tanh(linear_ref(x2) / (1.0 - dropout_rate))
    kept_match = jnp.isclose(out_train_a, scaled, atol=1e-4, rtol=1e-4)
    dropped = out_train_a == 0.0
    assert bool(jnp.all(kept_match | dropped))
    drop_frac = float(jnp.mean(dropped.astype(jnp.float32)))
    assert 0.0 < drop_frac < 0.6           # p=0.1 -> some but not most dropped

    print("KERNEL_OK")
</pallas_src>

<mosaic_0001>
module attributes {stable_mosaic.version = 11 : i64} {
  func.func @_decoder_kernel(%arg0: i32, %arg1: memref<1xi32, #tpu.memory_space<smem>>, %arg2: memref<16x128xf32, #tpu.memory_space<vmem>>, %arg3: memref<128x128xf32, #tpu.memory_space<vmem>>, %arg4: memref<1xf32, #tpu.memory_space<smem>>, %arg5: memref<16x1xf32, #tpu.memory_space<vmem>>) attributes {dimension_semantics = [#tpu.dimension_semantics<parallel>], iteration_bounds = array<i64: 1>, scalar_prefetch = 1 : i64, scratch_operands = 0 : i64, tpu.core_type = #tpu.core_type<tc>, window_params = [{transform_indices = @transform_0, window_bounds = array<i64: 16, 128>}, {pipeline_mode = #tpu.pipeline_mode<synchronous>, transform_indices = @transform_1, window_bounds = array<i64: 128, 128>}, {transform_indices = @transform_2, window_bounds = array<i64: 1>}, {transform_indices = @transform_3, window_bounds = array<i64: 16, 1>}]} {
    %c0 = arith.constant 0 : index
    %c0_0 = arith.constant 0 : index
    %0 = vector.load %arg2[%c0, %c0_0] : memref<16x128xf32, #tpu.memory_space<vmem>>, vector<16x128xf32>
    %c0_1 = arith.constant 0 : index
    %c0_2 = arith.constant 0 : index
    %1 = vector.load %arg3[%c0_1, %c0_2] : memref<128x128xf32, #tpu.memory_space<vmem>>, vector<128x128xf32>
    %cst = arith.constant dense<0.000000e+00> : vector<16x128xf32>
    %2 = tpu.matmul %0, %1, %cst {dimension_numbers = #tpu.dot_dimension_numbers<[1], [0], [0], [1], [0, 0, 1, 1], [], []>, precision = #tpu.contract_precision<fp32>} : vector<16x128xf32>, vector<128x128xf32>, vector<16x128xf32> -> vector<16x128xf32>
    %3 = vector.extract_strided_slice %2 {offsets = [0, 0], sizes = [16, 1], strides = [1, 1]} : vector<16x128xf32> to vector<16x1xf32>
    %c0_3 = arith.constant 0 : index
    %4 = memref.load %arg4[%c0_3] : memref<1xf32, #tpu.memory_space<smem>>
    %5 = vector.broadcast %4 : f32 to vector<16x1xf32>
    %6 = arith.addf %3, %5 : vector<16x1xf32>
    %7 = math.tanh %6 : vector<16x1xf32>
    %c0_4 = arith.constant 0 : index
    %c0_5 = arith.constant 0 : index
    %8 = vector.load %arg5[%c0_4, %c0_5] : memref<16x1xf32, #tpu.memory_space<vmem>>, vector<16x1xf32>
    tpu.vector_store %arg5[%c0_4, %c0_5], %7 {strides = array<i32>} : memref<16x1xf32, #tpu.memory_space<vmem>>, vector<16x1xf32>,
    return
  }
  func.func @transform_0(%arg0: i32, %arg1: memref<1xi32, #tpu.memory_space<smem>>) -> (i32, i32) {
    %c0_i32 = arith.constant 0 : i32
    %c0_i32_0 = arith.constant 0 : i32
    return %arg0, %c0_i32 : i32, i32
  }
  func.func @transform_1(%arg0: i32, %arg1: memref<1xi32, #tpu.memory_space<smem>>) -> (i32, i32) {
    %c0_i32 = arith.constant 0 : i32
    %c0_i32_0 = arith.constant 0 : i32
    %c0_i32_1 = arith.constant 0 : i32
    return %c0_i32, %c0_i32_0 : i32, i32
  }
  func.func @transform_2(%arg0: i32, %arg1: memref<1xi32, #tpu.memory_space<smem>>) -> i32 {
    %c0_i32 = arith.constant 0 : i32
    %c0_i32_0 = arith.constant 0 : i32
    return %c0_i32 : i32
  }
  func.func @transform_3(%arg0: i32, %arg1: memref<1xi32, #tpu.memory_space<smem>>) -> (i32, i32) {
    %c0_i32 = arith.constant 0 : i32
    %c0_i32_0 = arith.constant 0 : i32
    return %arg0, %c0_i32 : i32, i32
  }
}

</mosaic_0001>

<bundles_post_ra>
// kernel: tpu_custom_call.1
= control target key start
LH: loop header
LB: loop body
LE: loop exit
PB: predicated region body
PF: predicated region fallthrough
CT: control target
= control target key end

     0   :  { %11 = vsyncpa [#allocation6], 0  ;;  %s1666_s0 = inlined_call_operand.<no memory space> [shape: s32[1], index: 0, kind: input, shape index: {}]   ;;  %s1667_s1 = inlined_call_operand.hbm [shape: f32[16,128], index: 1, kind: input, shape index: {}]   ;;  %s1668_s2 = inlined_call_operand.hbm [shape: f32[128,128], index: 2, kind: input, shape index: {}]   ;;  %s1669_s3 = inlined_call_operand.<no memory space> [shape: f32[1], index: 3, kind: input, shape index: {}]   ;;  %s1670_s4 = inlined_call_operand.vmem [shape: f32[16,1], index: 4, kind: output, shape index: {}]  }
   0x1   :  { %12 = vsyncpa [#allocation8], 0  ;;  %s1338_s15 = smov [#allocation5]   ;;  %s1290_s0 = scalar_lea.hbm %s1667_s1, 256 }
   0x2   :  { %s18_s16 = sshll.u32 %s1338_s15, 4  ;;  %p1291_p0 = scmp.ne.s32.totalorder %s1667_s1, %s1290_s0  ;;  %s19_s16 = int_to_ptr.vmem [resolvable:$true] %s18_s16 }
   0x3   :  { %p1294_p1 = scmp.lt.u32.totalorder %s1290_s0, %s1667_s1 }
   0x5   :  { %p1296_p2 = pnand %p1294_p1, %p1291_p0 }
   0x7   :  { %1299 = shalt.err (!%p1296_p2)
}
   0x8   :  { %s1300_s23 = scalar_lea.vmem %s19_s16, 256  ;;  %p1305_p4 = scmp.lt.s32.totalorder %s19_s16, %s19_s16 }
   0x9   :  { %p1301_p3 = scmp.ne.s32.totalorder %s19_s16, %s1300_s23  ;;  %p1306_p5 = scmp.lt.s32.totalorder %s1300_s23, %s1300_s23 }
   0xb   :  { %p1307_p6 = por %p1306_p5, %p1305_p4 }
   0xd   :  { %p1308_p7 = pnand %p1307_p6, %p1301_p3 }
   0xf   :  { %1311 = shalt.err (!%p1308_p7)
}
  0x10   :  { %s1339_s24 = smov 128   ;;  %s1340_s25 = smov 8  }
  0x11   :  { %24 = dma.hbm_to_vmem [thread:$0]  %s1667_s1, 256, %s19_s16, [#allocation6], %s1339_s24, %s1339_s24, %s1340_s25  }
  0x12   :  { %s1341_s28 = smov [#allocation7]   ;;  %s1312_s6 = scalar_lea.hbm %s1668_s2, 2048 }
  0x13   :  { %s30_s29 = sshll.u32 %s1341_s28, 4  ;;  %p1313_p8 = scmp.ne.s32.totalorder %s1668_s2, %s1312_s6  ;;  %s31_s29 = int_to_ptr.vmem [resolvable:$true] %s30_s29 }
  0x14   :  { %p1316_p9 = scmp.lt.u32.totalorder %s1312_s6, %s1668_s2 }
  0x16   :  { %p1318_p10 = pnand %p1316_p9, %p1313_p8 }
  0x18   :  { %1321 = shalt.err (!%p1318_p10)
}
  0x19   :  { %s1322_s11 = scalar_lea.vmem %s31_s29, 2048  ;;  %p1327_p12 = scmp.lt.s32.totalorder %s31_s29, %s31_s29 }
  0x1a   :  { %p1323_p11 = scmp.ne.s32.totalorder %s31_s29, %s1322_s11  ;;  %p1328_p13 = scmp.lt.s32.totalorder %s1322_s11, %s1322_s11 }
  0x1c   :  { %p1329_p0 = por %p1328_p13, %p1327_p12 }
  0x1e   :  { %p1330_p1 = pnand %p1329_p0, %p1323_p11 }
  0x20   :  { %1333 = shalt.err (!%p1330_p1)
}
  0x21   :  { %36 = dma.hbm_to_vmem [thread:$0]  %s1668_s2, 2048, %s31_s29, [#allocation8], %s1339_s24, %s1339_s24, %s1340_s25  }
  0x22   :  { %1334 = dma.done.wait [#allocation6], 256  }
  0x23   :  { %1335 = vsyncadd [#allocation6], 4294967040 }
  0x24   :  { %1336 = dma.done.wait [#allocation8], 2048  }
  0x25   :  { %1337 = vsyncadd [#allocation8], 4294965248  ;;  %v47_v0 = vld [vmem:[#allocation7] sm:$0xff]  ;;  %v48_v1 = vld [vmem:[#allocation7 + $0x8] sm:$0xff]  ;;  %vm753_vm0 = vcmask 7168  }
  0x26   :  { %v49_v2 = vld [vmem:[#allocation7 + $0x10] sm:$0xff]  ;;  %v64_v3 = vand.u32 4294901760, %v47_v0  ;;  %v67_v4 = vand.u32 4294901760, %v48_v1  ;;  %v1391_v5 = vld [vmem:[#allocation7 + $0x18] sm:$0xff]  ;;  %v1393_v7 = vld [vmem:[#allocation7 + $0x20] sm:$0xff] }
  0x27   :  { %v70_v6 = vand.u32 4294901760, %v49_v2  ;;  %v1395_v8 = vld [vmem:[#allocation7 + $0x28] sm:$0xff]  ;;  %v73_v9 = vand.u32 4294901760, %v1391_v5  ;;  %v76_v11 = vand.u32 4294901760, %v1393_v7  ;;  %v1404_v14 = vld [vmem:[#allocation7 + $0x30] sm:$0xff]  ;;  %v1406_v15 = vld [vmem:[#allocation7 + $0x38] sm:$0xff] }
  0x28   :  { %v1398_v10 = vpack.c.bf16 %v67_v4, %v64_v3  ;;  %v79_v12 = vand.u32 4294901760, %v1395_v8  ;;  %v45_v16 = vld [vmem:[#allocation5] sm:$0xff]  ;;  %v82_v19 = vand.u32 4294901760, %v1404_v14  ;;  %v85_v20 = vand.u32 4294901760, %v1406_v15  ;;  %v1424_v21 = vld [vmem:[#allocation7 + $0x40] sm:$0xff]  ;;  %v1426_v22 = vld [vmem:[#allocation7 + $0x48] sm:$0xff] }
  0x29   :  { %v1402_v13 = vpack.c.bf16 %v73_v9, %v70_v6  ;;  %v1412_v17 = vand.u32 4294901760, %v45_v16  ;;  %v88_v26 = vand.u32 4294901760, %v1424_v21  ;;  %v91_v27 = vand.u32 4294901760, %v1426_v22  ;;  %v1444_v28 = vld [vmem:[#allocation7 + $0x50] sm:$0xff]  ;;  %v1446_v29 = vld [vmem:[#allocation7 + $0x58] sm:$0xff]  ;;  %v1461_v36 = vld [vmem:[#allocation7 + $0x60] sm:$0xff] }
  0x2a   :  { %1081 = vmatprep.subr.bf16.mxu1 %v1398_v10  ;;  %1177 = vmatprep.subr.bf16.mxu0 %v1398_v10  ;;  %v1420_v18 = vpack.c.bf16 %v79_v12, %v76_v11  ;;  %v1440_v25 = vpack.c.bf16 %v85_v20, %v82_v19  ;;  %v94_v31 = vand.u32 4294901760, %v1444_v28  ;;  %v46_v33 = vld [vmem:[#allocation5 + $0x8] sm:$0xff]  ;;  %v97_v35 = vand.u32 4294901760, %v1446_v29  ;;  %v1463_v37 = vld [vmem:[#allocation7 + $0x68] sm:$0xff]  ;;  %v1475_v43 = vld [vmem:[#allocation7 + $0x70] sm:$0xff] }
  0x2b   :  { %1083 = vmatpush3.bf16.msra.mxu1 %v1398_v10  ;;  %1179 = vmatpush3.bf16.msra.mxu0 %v1398_v10  ;;  %v1429_v23 = vsub.f32 %v45_v16, %v1412_v17  ;;  %v1458_v34 = vpack.c.bf16 %v91_v27, %v88_v26  ;;  %v1465_v38 = vsub.f32 %v47_v0, %v64_v3  ;;  %v1469_v40 = vand.u32 4294901760, %v46_v33  ;;  %v1477_v44 = vld [vmem:[#allocation7 + $0x78] sm:$0xff] }
  0x2c   :  { %1085 = vmatprep.subr.bf16.mxu1 %v1402_v13  ;;  %1181 = vmatprep.subr.bf16.mxu0 %v1402_v13  ;;  %v1467_v39 = vsub.f32 %v48_v1, %v67_v4  ;;  %v100_v41 = vand.u32 4294901760, %v1461_v36  ;;  %v103_v42 = vand.u32 4294901760, %v1463_v37  ;;  %v1479_v45 = vsub.f32 %v49_v2, %v70_v6 }
  0x2d   :  { %v146_v24 = vand.u32 4294901760, %v1429_v23  ;;  %v1487_v46 = vpack.c.bf16 %v97_v35, %v94_v31  ;;  %v167_v47 = vand.u32 4294901760, %v1465_v38  ;;  %v1492_v49 = vsub.f32 %v1391_v5, %v73_v9 }
  0x2e   :  { %v174_v48 = vand.u32 4294901760, %v1467_v39  ;;  %v106_v50 = vand.u32 4294901760, %v1475_v43  ;;  %v109_v51 = vand.u32 4294901760, %v1477_v44  ;;  %v1497_v52 = vsub.f32 %v46_v33, %v1469_v40 }
  0x2f   :  { %1087 = vmatpush3.bf16.msra.mxu1 %v1402_v13  ;;  %1183 = vmatpush3.bf16.msra.mxu0 %v1402_v13  ;;  %v147_v30 = vsub.f32 %v1429_v23, %v146_v24  ;;  %v1505_v53 = vpack.c.bf16 %v103_v42, %v100_v41  ;;  %v181_v54 = vand.u32 4294901760, %v1479_v45  ;;  %v1511_v55 = vsub.f32 %v1393_v7, %v76_v11 }
  0x30   :  { %1089 = vmatprep.subr.bf16.mxu1 %v1420_v18  ;;  %1185 = vmatprep.subr.bf16.mxu0 %v1420_v18  ;;  %v168_v56 = vsub.f32 %v1465_v38, %v167_v47  ;;  %v175_v57 = vsub.f32 %v1467_v39, %v174_v48  ;;  %v188_v58 = vand.u32 4294901760, %v1492_v49  ;;  %v1521_v59 = vsub.f32 %v1395_v8, %v79_v12 }
  0x31   :  { %1007 = vmatprep.mubr.f32.mxu0 %v146_v24  ;;  %v148_v32 = vand.u32 4294901760, %v147_v30  ;;  %v1527_v60 = vpack.c.bf16 %v109_v51, %v106_v50  ;;  %v156_v61 = vand.u32 4294901760, %v1497_v52  ;;  %v182_v62 = vsub.f32 %v1479_v45, %v181_v54 }
  0x32   :  { %v195_v63 = vand.u32 4294901760, %v1511_v55  ;;  %v1537_v0 = vsub.f32 %v1404_v14, %v82_v19  ;;  %v1542_v1 = vsub.f32 %v1406_v15, %v85_v20  ;;  %v169_v2 = vand.u32 4294901760, %v168_v56 }
  0x33   :  { %1091 = vmatpush3.bf16.msra.mxu1 %v1420_v18  ;;  %1187 = vmatpush3.bf16.msra.mxu0 %v1420_v18  ;;  %v176_v3 = vand.u32 4294901760, %v175_v57  ;;  %v189_v4 = vsub.f32 %v1492_v49, %v188_v58  ;;  %v202_v5 = vand.u32 4294901760, %v1521_v59  ;;  %v1208_v6 = vpack.c.bf16 %v174_v48, %v167_v47 }
  0x34   :  { %1093 = vmatprep.subr.bf16.mxu1 %v1440_v25  ;;  %1189 = vmatprep.subr.bf16.mxu0 %v1440_v25  ;;  %v157_v7 = vsub.f32 %v1497_v52, %v156_v61  ;;  %v1552_v8 = vsub.f32 %v1424_v21, %v88_v26  ;;  %v183_v9 = vand.u32 4294901760, %v182_v62  ;;  %v196_v11 = vsub.f32 %v1511_v55, %v195_v63 }
  0x35   :  { %902 = vmatprep.mubr.f32.mxu1 %v148_v32  ;;  %v209_v12 = vand.u32 4294901760, %v1537_v0  ;;  %v216_v14 = vand.u32 4294901760, %v1542_v1  ;;  %v1112_v15 = vpack.c.bf16 %v176_v3, %v169_v2  ;;  %v190_v16 = vand.u32 4294901760, %v189_v4 }
  0x36   :  { %v203_v19 = vsub.f32 %v1521_v59, %v202_v5  ;;  %v1565_v20 = vsub.f32 %v1426_v22, %v91_v27  ;;  %v158_v21 = vand.u32 4294901760, %v157_v7  ;;  %v1212_v24 = vpack.c.bf16 %v188_v58, %v181_v54 }
  0x37   :  { %1095 = vmatpush3.bf16.msra.mxu1 %v1440_v25  ;;  %1191 = vmatpush3.bf16.msra.mxu0 %v1440_v25  ;;  %v223_v26 = vand.u32 4294901760, %v1552_v8  ;;  %v1571_v30 = vsub.f32 %v1444_v28, %v94_v31  ;;  %v210_v32 = vsub.f32 %v1537_v0, %v209_v12  ;;  %v217_v33 = vsub.f32 %v1542_v1, %v216_v14 }
  0x38   :  { %1097 = vmatprep.subr.bf16.mxu1 %v1458_v34  ;;  %1193 = vmatprep.subr.bf16.mxu0 %v1458_v34  ;;  %v1580_v22 = vsub.f32 %v1446_v29, %v97_v35  ;;  %v1116_v27 = vpack.c.bf16 %v190_v16, %v183_v9  ;;  %v197_v47 = vand.u32 4294901760, %v196_v11  ;;  %v204_v48 = vand.u32 4294901760, %v203_v19 }
  0x39   :  { %v230_v28 = vand.u32 4294901760, %v1565_v20  ;;  %v1216_v31 = vpack.c.bf16 %v202_v5, %v195_v63  ;;  %v224_v54 = vsub.f32 %v1552_v8, %v223_v26  ;;  %v1587_v56 = vsub.f32 %v1461_v36, %v100_v41 }
  0x3a   :  { %v211_v29 = vand.u32 4294901760, %v210_v32  ;;  %v218_v35 = vand.u32 4294901760, %v217_v33  ;;  %v237_v57 = vand.u32 4294901760, %v1571_v30  ;;  %v244_v58 = vand.u32 4294901760, %v1580_v22 }
  0x3b   :  { %1099 = vmatpush3.bf16.msra.mxu1 %v1458_v34  ;;  %1195 = vmatpush3.bf16.msra.mxu0 %v1458_v34  ;;  %v1120_v62 = vpack.c.bf16 %v204_v48, %v197_v47  ;;  %v1595_v63 = vsub.f32 %v1463_v37, %v103_v42  ;;  %v1220_v36 = vpack.c.bf16 %v216_v14, %v209_v12  ;;  %v225_v41 = vand.u32 4294901760, %v224_v54 }
  0x3c   :  { %1101 = vmatprep.subr.bf16.mxu1 %v1487_v46  ;;  %1197 = vmatprep.subr.bf16.mxu0 %v1487_v46  ;;  %v1124_v2 = vpack.c.bf16 %v218_v35, %v211_v29  ;;  %v238_v3 = vsub.f32 %v1571_v30, %v237_v57  ;;  %v245_v4 = vsub.f32 %v1580_v22, %v244_v58  ;;  %v251_v5 = vand.u32 4294901760, %v1587_v56 }
  0x3d   :  { %v258_v37 = vand.u32 4294901760, %v1595_v63  ;;  %v1606_v42 = vsub.f32 %v1475_v43, %v106_v50  ;;  %v1611_v7 = vsub.f32 %v1477_v44, %v109_v51  ;;  %v1224_v9 = vpack.c.bf16 %v230_v28, %v223_v26 }
  0x3e   :  { %v239_v11 = vand.u32 4294901760, %v238_v3  ;;  %v246_v12 = vand.u32 4294901760, %v245_v4  ;;  %v252_v14 = vsub.f32 %v1587_v56, %v251_v5  ;;  %v1228_v51 = vpack.c.bf16 %v244_v58, %v237_v57 }
  0x3f   :  { %1103 = vmatpush3.bf16.msra.mxu1 %v1487_v46  ;;  %1199 = vmatpush3.bf16.msra.mxu0 %v1487_v46  ;;  %v259_v16 = vsub.f32 %v1595_v63, %v258_v37  ;;  %v265_v43 = vand.u32 4294901760, %v1606_v42  ;;  %v272_v50 = vand.u32 4294901760, %v1611_v7  ;;  %v1232_v33 = vpack.c.bf16 %v258_v37, %v251_v5 }
  0x40   :  { %1105 = vmatprep.subr.bf16.mxu1 %v1505_v53  ;;  %1201 = vmatprep.subr.bf16.mxu0 %v1505_v53  ;;  %v1132_v44 = vpack.c.bf16 %v246_v12, %v239_v11  ;;  %v253_v19 = vand.u32 4294901760, %v252_v14  ;;  %v1148_v54 = vpack.c.bf16 %v1492_v49, %v1479_v45 }
  0x41   :  { %v273_v26 = vsub.f32 %v1611_v7, %v272_v50 }
  0x43   :  { %1107 = vmatpush3.bf16.msra.mxu1 %v1505_v53  ;;  %1203 = vmatpush3.bf16.msra.mxu0 %v1505_v53  ;;  %v274_v47 = vand.u32 4294901760, %v273_v26 }
  0x44   :  { %1109 = vmatprep.subr.bf16.mxu1 %v1527_v60  ;;  %1205 = vmatprep.subr.bf16.mxu0 %v1527_v60 }
  0x47   :  { %1111 = vmatpush3.bf16.msra.mxu1 %v1527_v60  ;;  %1207 = vmatpush3.bf16.msra.mxu0 %v1527_v60 }
  0x48   :  { %1113 = vmatprep.subr.bf16.mxu1 %v1112_v15  ;;  %1209 = vmatprep.subr.bf16.mxu0 %v1208_v6 }
  0x4a   :  { %903 = vmatmul.mubr.f32.vlgmr.msra.gmra.mrb[0].mxu1 %v158_v21  ;;  %1008 = vmatmul.mubr.f32.vlgmr.msra.gmra.mrb[0].mxu0 %v156_v61  ;;  %v231_v61 = vsub.f32 %v1565_v20, %v230_v28  ;;  %v260_v21 = vand.u32 4294901760, %v259_v16  ;;  %v1236_v28 = vpack.c.bf16 %v272_v50, %v265_v43 }
  0x4b   :  { %1115 = vmatpush3.bf16.msra.mxu1 %v1112_v15  ;;  %1211 = vmatpush3.bf16.msra.mxu0 %v1208_v6 }
  0x4c   :  { %1117 = vmatprep.subr.bf16.mxu1 %v1116_v27  ;;  %1213 = vmatprep.subr.bf16.mxu0 %v1212_v24  ;;  %v232_v6 = vand.u32 4294901760, %v231_v61  ;;  %v1136_v32 = vpack.c.bf16 %v260_v21, %v253_v19 }
  0x4d   :  { %937 = vmatprep.mubr.f32.mxu1 %v1412_v17  ;;  %1042 = vmatprep.mubr.f32.mxu0 %v1412_v17 }
  0x4e   :  { %v1128_v15 = vpack.c.bf16 %v232_v6, %v225_v41 }
  0x4f   :  { %1119 = vmatpush3.bf16.msra.mxu1 %v1116_v27  ;;  %1215 = vmatpush3.bf16.msra.mxu0 %v1212_v24  ;;  %v266_v24 = vsub.f32 %v1606_v42, %v265_v43 }
  0x50   :  { %1121 = vmatprep.subr.bf16.mxu1 %v1120_v62  ;;  %1217 = vmatprep.subr.bf16.mxu0 %v1216_v31 }
  0x51   :  { %v267_v27 = vand.u32 4294901760, %v266_v24 }
  0x53   :  { %1123 = vmatpush3.bf16.msra.mxu1 %v1120_v62  ;;  %1219 = vmatpush3.bf16.msra.mxu0 %v1216_v31  ;;  %v1140_v48 = vpack.c.bf16 %v274_v47, %v267_v27  ;;  %v1144_v31 = vpack.c.bf16 %v1467_v39, %v1465_v38  ;;  %v1152_v38 = vpack.c.bf16 %v1521_v59, %v1511_v55 }
  0x54   :  { %1125 = vmatprep.subr.bf16.mxu1 %v1124_v2  ;;  %1221 = vmatprep.subr.bf16.mxu0 %v1220_v36  ;;  %v1156_v39 = vpack.c.bf16 %v1542_v1, %v1537_v0 }
  0x57   :  { %1127 = vmatpush3.bf16.msra.mxu1 %v1124_v2  ;;  %1223 = vmatpush3.bf16.msra.mxu0 %v1220_v36 }
  0x58   :  { %1129 = vmatprep.subr.bf16.mxu1 %v1128_v15  ;;  %1225 = vmatprep.subr.bf16.mxu0 %v1224_v9 }
  0x5b   :  { %1131 = vmatpush3.bf16.msra.mxu1 %v1128_v15  ;;  %1227 = vmatpush3.bf16.msra.mxu0 %v1224_v9 }
  0x5c   :  { %1133 = vmatprep.subr.bf16.mxu1 %v1132_v44  ;;  %1229 = vmatprep.subr.bf16.mxu0 %v1228_v51 }
  0x5f   :  { %1135 = vmatpush3.bf16.msra.mxu1 %v1132_v44  ;;  %1231 = vmatpush3.bf16.msra.mxu0 %v1228_v51 }
  0x60   :  { %1137 = vmatprep.subr.bf16.mxu1 %v1136_v32  ;;  %1233 = vmatprep.subr.bf16.mxu0 %v1232_v33 }
  0x63   :  { %1139 = vmatpush3.bf16.msra.mxu1 %v1136_v32  ;;  %1235 = vmatpush3.bf16.msra.mxu0 %v1232_v33 }
  0x64   :  { %1141 = vmatprep.subr.bf16.mxu1 %v1140_v48  ;;  %1237 = vmatprep.subr.bf16.mxu0 %v1236_v28 }
  0x67   :  { %1143 = vmatpush3.bf16.msra.mxu1 %v1140_v48  ;;  %1239 = vmatpush3.bf16.msra.mxu0 %v1236_v28 }
  0x68   :  { %1145 = vmatprep.subr.bf16.mxu1 %v1144_v31  ;;  %1241 = vmatprep.subr.bf16.mxu0 %v1398_v10 }
  0x6a   :  { %938 = vmatmul.mubr.f32.vlgmr.msra.gmra.mrb[0].mxu1 %v1469_v40  ;;  %1043 = vmatmul.mubr.f32.vlgmr.msra.gmra.mrb[0].mxu0 %v1469_v40 }
  0x6b   :  { %1147 = vmatpush3.bf16.msra.mxu1 %v1144_v31  ;;  %1243 = vmatpush3.bf16.msra.mxu0 %v1398_v10  ;;  %v1160_v10 = vpack.c.bf16 %v1565_v20, %v1552_v8 }
  0x6c   :  { %1149 = vmatprep.subr.bf16.mxu1 %v1148_v54  ;;  %1245 = vmatprep.subr.bf16.mxu0 %v1402_v13 }
  0x6d   :  { %972 = vmatprep.mubr.f32.mxu1 %v1429_v23  ;;  %1077 = vmatprep.mubr.f32.mxu0 %v1412_v17  ;;  %v1168_v17 = vpack.c.bf16 %v1595_v63, %v1587_v56 }
  0x6f   :  { %1151 = vmatpush3.bf16.msra.mxu1 %v1148_v54  ;;  %1247 = vmatpush3.bf16.msra.mxu0 %v1402_v13  ;;  %v1164_v13 = vpack.c.bf16 %v1580_v22, %v1571_v30 }
  0x70   :  { %1153 = vmatprep.subr.bf16.mxu1 %v1152_v38  ;;  %1249 = vmatprep.subr.bf16.mxu0 %v1420_v18 }
  0x73   :  { %1155 = vmatpush3.bf16.msra.mxu1 %v1152_v38  ;;  %1251 = vmatpush3.bf16.msra.mxu0 %v1420_v18  ;;  %v1172_v18 = vpack.c.bf16 %v1611_v7, %v1606_v42 }
  0x74   :  { %1157 = vmatprep.subr.bf16.mxu1 %v1156_v39  ;;  %1253 = vmatprep.subr.bf16.mxu0 %v1440_v25 }
  0x77   :  { %1159 = vmatpush3.bf16.msra.mxu1 %v1156_v39  ;;  %1255 = vmatpush3.bf16.msra.mxu0 %v1440_v25 }
  0x78   :  { %1161 = vmatprep.subr.bf16.mxu1 %v1160_v10  ;;  %1257 = vmatprep.subr.bf16.mxu0 %v1458_v34 }
  0x7b   :  { %1163 = vmatpush3.bf16.msra.mxu1 %v1160_v10  ;;  %1259 = vmatpush3.bf16.msra.mxu0 %v1458_v34  ;;  %v748_v34 = vstv %s1669_s3 }
  0x7c   :  { %1165 = vmatprep.subr.bf16.mxu1 %v1164_v13  ;;  %1261 = vmatprep.subr.bf16.mxu0 %v1487_v46 }
  0x7f   :  { %1167 = vmatpush3.bf16.msra.mxu1 %v1164_v13  ;;  %1263 = vmatpush3.bf16.msra.mxu0 %v1487_v46 }
  0x80   :  { %1169 = vmatprep.subr.bf16.mxu1 %v1168_v17  ;;  %1265 = vmatprep.subr.bf16.mxu0 %v1505_v53 }
  0x83   :  { %1171 = vmatpush3.bf16.msra.mxu1 %v1168_v17  ;;  %1267 = vmatpush3.bf16.msra.mxu0 %v1505_v53 }
  0x84   :  { %1173 = vmatprep.subr.bf16.mxu1 %v1172_v18  ;;  %1269 = vmatprep.subr.bf16.mxu0 %v1527_v60 }
  0x87   :  { %1175 = vmatpush3.bf16.msra.mxu1 %v1172_v18  ;;  %1271 = vmatpush3.bf16.msra.mxu0 %v1527_v60 }
  0x8a   :  { %973 = vmatmul.mubr.f32.vlgmr.msra.gmra.mrb[0].mxu1 %v1497_v52  ;;  %1078 = vmatmul.mubr.f32.vlgmr.msra.gmra.mrb[0].mxu0 %v1469_v40 }
 0x15d   :  { %v974_v23 = vpop.f32.mrb[0].mxu1  ;;  %v1079_v25 = vpop.f32.mrb[0].mxu0 }
 0x15e   :  { %v1272_v45 = vadd.f32 %v1079_v25, %v974_v23  ;;  %v421_v46 = vpop.f32.mrb[1].mxu1  ;;  %v737_v49 = vpop.f32.mrb[1].mxu0 }
 0x15f   :  { %v1273_v53 = vadd.f32 %v737_v49, %v421_v46 }
 0x160   :  { %v750_v55 = vadd.f32 %v1272_v45, %v748_v34 }
 0x161   :  { %v749_v59 = vadd.f32 %v1273_v53, %v748_v34 }
 0x162   :  { %1286 = vtanh.f32 %v750_v55 }
 0x163   :  { %1288 = vtanh.f32 %v749_v59 }
 0x16c   :  { %v1287_v60 = vpop.eup %1286 }
 0x16d   :  { %v1289_v0 = vpop.eup %1288  ;;  %755 = vst.msk [vmem:[%s1670_s4 + $0x8] sm:$0xff] %vm753_vm0, %v1287_v60 }
 0x16e   :  { %754 = vst.msk [vmem:[%s1670_s4] sm:$0xff] %vm753_vm0, %v1289_v0 }
 0x16f   :  { %760 = vsyncpa [#allocation6], 1 }
 0x170   :  { %761 = vsyncpa [#allocation8], 1 }

</bundles_post_ra>
